<compile_context>
chip_gen: v6e
topology: v6e:2x2x1
jax: 0.10.0
libtpu: 0.0.40
codegen_flags: <defaults>
</compile_context>

<pallas_src>
import math
import functools

import jax
import jax.numpy as jnp
from jax.experimental import pallas as pl
from jax.experimental.pallas import tpu as pltpu


# ---------------------------------------------------------------------------
# Kernels
# ---------------------------------------------------------------------------

def _rff_kernel_single(inv_ref, x_ref, w_ref, b_ref, o_ref):
    """Single-K-step: full K in one tile -> no reduction axis, no scratch.

    inv_ref : SMEM (1, 1)   precomputed 1 / relu(kernel_scale)
    x_ref   : VMEM (tm, K)  input tile
    w_ref   : VMEM (K, tn)  weight tile
    b_ref   : VMEM (1, tn)  bias tile
    o_ref   : VMEM (tm, tn) output tile
    """
    acc = jnp.dot(x_ref[...], w_ref[...], preferred_element_type=jnp.float32)
    o_ref[...] = jnp.cos(acc * inv_ref[0, 0] + b_ref[...]).astype(o_ref.dtype)


def _rff_kernel_multi_f32out(inv_ref, x_ref, w_ref, b_ref, o_ref):
    """Multi-K-step, float32 output: accumulate directly into o_ref (its block
    index ignores k, so the tile is resident across the reduction); apply the
    cos/scale/bias epilogue in place on the last k step.  No VMEM scratch."""
    k = pl.program_id(2)

    @pl.when(k == 0)
    def _():
        o_ref[...] = jnp.zeros_like(o_ref)

    o_ref[...] += jnp.dot(x_ref[...], w_ref[...],
                          preferred_element_type=jnp.float32)

    @pl.when(k == pl.num_programs(2) - 1)
    def _():
        o_ref[...] = jnp.cos(o_ref[...] * inv_ref[0, 0] + b_ref[...])


def _rff_kernel_multi_scratch(inv_ref, x_ref, w_ref, b_ref, o_ref, acc_ref):
    """Multi-K-step, non-f32 output: keep an f32 accumulator scratch and cast
    only on the final k step."""
    k = pl.program_id(2)

    @pl.when(k == 0)
    def _():
        acc_ref[...] = jnp.zeros_like(acc_ref)

    acc_ref[...] += jnp.dot(x_ref[...], w_ref[...],
                            preferred_element_type=jnp.float32)

    @pl.when(k == pl.num_programs(2) - 1)
    def _():
        o_ref[...] = jnp.cos(acc_ref[...] * inv_ref[0, 0] + b_ref[...]).astype(o_ref.dtype)


# ---------------------------------------------------------------------------
# Tile / padding planning
# ---------------------------------------------------------------------------

_TM_CAP = 512      # rows of the output tile   (MXU-friendly, multiple of 128)
_TN_CAP = 1024     # lanes of the output tile  (multiple of 128 -> unmasked vst)
_TK_CAP = 512      # reduction tile


def _round_up(x, m):
    return ((x + m - 1) // m) * m


def _largest_divisor_tile(dim, cap, align):
    """dim is a multiple of `align`; largest multiple of `align` <= cap that
    divides dim (falls back to `align`, which always divides dim)."""
    if dim <= cap:
        return dim
    t = (cap // align) * align
    while t > align:
        if dim % t == 0:
            return t
        t -= align
    return align


def _plan(M, N, K, operand_is_bf16):
    """Padded shapes + tile sizes.  Padding (zeros) keeps the matmul exact and
    avoids tiny tiles / masked stores for awkward shapes."""
    row_align = 16 if operand_is_bf16 else 8   # sublane packing for bf16 x

    # M: small M -> one full-row tile; large M -> 128-aligned tiles up to 512.
    if M <= _TM_CAP:
        Mp = _round_up(M, row_align)
        tm = Mp
    else:
        Mp = _round_up(M, 128)
        tm = _largest_divisor_tile(Mp, _TM_CAP, 128)

    # N: always lane-dense (multiple of 128), tiles up to 1024.
    Np = _round_up(N, 128)
    tn = Np if Np <= _TN_CAP else _largest_divisor_tile(Np, _TN_CAP, 128)

    # K: if it fits one tile use the full (unpadded) dim -> single-K fast path;
    # otherwise pad to a multiple of 128 and split.
    if K <= _TK_CAP:
        Kp, tk = K, K
    else:
        Kp = _round_up(K, 128)
        tk = _largest_divisor_tile(Kp, _TK_CAP, 128)

    # v7x megacore: if the (i, j) "parallel" grid would have a single point,
    # split tn (keeping it a multiple of 128) so both TensorCores get work.
    if (Mp // tm) * (Np // tn) < 2 and tn >= 256 and tn % 256 == 0:
        tn //= 2

    return Mp, Np, Kp, tm, tn, tk


# ---------------------------------------------------------------------------
# Wrapper
# ---------------------------------------------------------------------------

@functools.partial(jax.jit, static_argnames=("operand_dtype", "out_dtype"))
def random_fourier_features(x, weight, bias, kernel_scale, *,
                            operand_dtype=None, out_dtype=None):
    """x: (M, K), weight: (K, N), bias: (N,), kernel_scale: scalar.

    operand_dtype: optional dtype (e.g. jnp.bfloat16) for the MXU operand
      stream; x / weight are cast *before* the kernel so the HBM->VMEM DMA is
      halved on v6e/v7x.  Accumulation stays float32 either way.
    out_dtype: output dtype (defaults to x.dtype).
    """
    M, K = x.shape
    Kw, N = weight.shape
    assert K == Kw, "x / weight inner-dim mismatch"
    out_dtype = x.dtype if out_dtype is None else out_dtype
    operand_is_bf16 = operand_dtype is not None and \
        jnp.dtype(operand_dtype) == jnp.bfloat16

    Mp, Np, Kp, tm, tn, tk = _plan(M, N, K, operand_is_bf16)

    # Zero-pad to the planned shapes (exact: padded K rows/cols contribute 0,
    # padded M/N rows/cols are sliced off the output).
    xp = x if (Mp == M and Kp == K) else jnp.pad(x, ((0, Mp - M), (0, Kp - K)))
    wp = weight if (Kp == K and Np == N) else \
        jnp.pad(weight, ((0, Kp - K), (0, Np - N)))
    bp = bias if Np == N else jnp.pad(bias, (0, Np - N))
    bp = bp.reshape(1, Np).astype(jnp.float32)

    if operand_dtype is not None:
        # bf16-at-rest: halve the weight / input byte stream into VMEM.
        xp = xp.astype(operand_dtype)
        wp = wp.astype(operand_dtype)

    # One scalar reciprocal in the wrapper; the kernel epilogue is a plain
    # multiply.  (relu(scale)==0 -> inf, matching the reference semantics.)
    inv = (1.0 / jnp.maximum(jnp.asarray(kernel_scale, jnp.float32).reshape(()),
                             0.0)).reshape(1, 1)

    if tk == Kp:
        # Single reduction step: 2-D grid, no accumulator, no scratch.
        grid = (Mp // tm, Np // tn)
        grid_spec = pltpu.PrefetchScalarGridSpec(
            num_scalar_prefetch=0,
            grid=grid,
            in_specs=[
                pl.BlockSpec((1, 1), lambda i, j: (0, 0),
                             memory_space=pltpu.SMEM),
                pl.BlockSpec((tm, Kp), lambda i, j: (i, 0)),
                pl.BlockSpec((Kp, tn), lambda i, j: (0, j)),
                pl.BlockSpec((1, tn), lambda i, j: (0, j)),
            ],
            out_specs=pl.BlockSpec((tm, tn), lambda i, j: (i, j)),
            scratch_shapes=[],
        )
        kernel = _rff_kernel_single
        dim_sem = ("parallel", "parallel")
    else:
        # K-reduction on the last grid axis.
        grid = (Mp // tm, Np // tn, Kp // tk)
        in_specs = [
            pl.BlockSpec((1, 1), lambda i, j, k: (0, 0),
                         memory_space=pltpu.SMEM),
            pl.BlockSpec((tm, tk), lambda i, j, k: (i, k)),
            pl.BlockSpec((tk, tn), lambda i, j, k: (k, j)),
            pl.BlockSpec((1, tn), lambda i, j, k: (0, j)),
        ]
        out_specs = pl.BlockSpec((tm, tn), lambda i, j, k: (i, j))
        if jnp.dtype(out_dtype) == jnp.float32:
            kernel = _rff_kernel_multi_f32out
            scratch = []                       # accumulate directly into o_ref
        else:
            kernel = _rff_kernel_multi_scratch
            scratch = [pltpu.VMEM((tm, tn), jnp.float32)]
        grid_spec = pltpu.PrefetchScalarGridSpec(
            num_scalar_prefetch=0,
            grid=grid,
            in_specs=in_specs,
            out_specs=out_specs,
            scratch_shapes=scratch,
        )
        dim_sem = ("parallel", "parallel", "arbitrary")

    out = pl.pallas_call(
        kernel,
        out_shape=jax.ShapeDtypeStruct((Mp, Np), out_dtype),
        grid_spec=grid_spec,
        compiler_params=pltpu.CompilerParams(
            dimension_semantics=dim_sem,
            vmem_limit_bytes=32 * 1024 * 1024,
        ),
    )(inv, xp, wp, bp)

    if Mp != M or Np != N:
        out = out[:M, :N]
    return out


# ---------------------------------------------------------------------------
# Demo / correctness check
# ---------------------------------------------------------------------------

if __name__ == "__main__":
    key = jax.random.PRNGKey(0)

    # ---- Test 1: module-like shapes (gaussian kernel, default scale) -------
    in_features, out_features, batch = 64, 256, 16
    k_w, k_b, k_x, k_w2, k_b2, k_x2 = jax.random.split(key, 6)

    weight = jax.random.normal(k_w, (in_features, out_features), jnp.float32)
    bias = jax.random.uniform(k_b, (out_features,), jnp.float32) * (2.0 * math.pi)
    kernel_scale = jnp.float32(math.sqrt(in_features / 2.0))
    x = jax.random.normal(k_x, (batch, in_features), jnp.float32)

    out = jax.block_until_ready(random_fourier_features(x, weight, bias, kernel_scale))
    ref = jnp.cos(
        jnp.dot(x, weight / jnp.maximum(kernel_scale, 0.0),
                precision=jax.lax.Precision.HIGHEST) + bias)
    assert out.shape == (batch, out_features)
    assert jnp.allclose(out, ref, atol=1e-5, rtol=1e-5), "mismatch vs reference (test 1)"

    # ---- Test 2: awkward shapes -> padding + multi-K accumulation path -----
    in2, out2, batch2 = 600, 300, 40
    weight2 = jax.random.normal(k_w2, (in2, out2), jnp.float32)
    bias2 = jax.random.uniform(k_b2, (out2,), jnp.float32) * (2.0 * math.pi)
    scale2 = jnp.float32(math.sqrt(in2 / 2.0))
    x2 = jax.random.normal(k_x2, (batch2, in2), jnp.float32)

    out_b = jax.block_until_ready(random_fourier_features(x2, weight2, bias2, scale2))
    ref_b = jnp.cos(
        jnp.dot(x2, weight2 / jnp.maximum(scale2, 0.0),
                precision=jax.lax.Precision.HIGHEST) + bias2)
    assert out_b.shape == (batch2, out2)
    assert jnp.allclose(out_b, ref_b, atol=1e-4, rtol=1e-4), "mismatch vs reference (test 2)"

    print("KERNEL_OK")
</pallas_src>

<mosaic_0001>
module attributes {stable_mosaic.version = 11 : i64} {
  func.func @_rff_kernel_single(%arg0: i32, %arg1: i32, %arg2: memref<1x1xf32, #tpu.memory_space<smem>>, %arg3: memref<16x64xf32, #tpu.memory_space<vmem>>, %arg4: memref<64x128xf32, #tpu.memory_space<vmem>>, %arg5: memref<1x128xf32, #tpu.memory_space<vmem>>, %arg6: memref<16x128xf32, #tpu.memory_space<vmem>>) attributes {dimension_semantics = [#tpu.dimension_semantics<parallel>, #tpu.dimension_semantics<parallel>], iteration_bounds = array<i64: 1, 2>, scalar_prefetch = 0 : i64, scratch_operands = 0 : i64, tpu.core_type = #tpu.core_type<tc>, window_params = [{transform_indices = @transform_0, window_bounds = array<i64: 1, 1>}, {transform_indices = @transform_1, window_bounds = array<i64: 16, 64>}, {transform_indices = @transform_2, window_bounds = array<i64: 64, 128>}, {transform_indices = @transform_3, window_bounds = array<i64: 1, 128>}, {transform_indices = @transform_4, window_bounds = array<i64: 16, 128>}]} {
    %c0 = arith.constant 0 : index
    %c0_0 = arith.constant 0 : index
    %0 = vector.load %arg3[%c0, %c0_0] : memref<16x64xf32, #tpu.memory_space<vmem>>, vector<16x64xf32>
    %c0_1 = arith.constant 0 : index
    %c0_2 = arith.constant 0 : index
    %1 = vector.load %arg4[%c0_1, %c0_2] : memref<64x128xf32, #tpu.memory_space<vmem>>, vector<64x128xf32>
    %cst = arith.constant dense<0.000000e+00> : vector<16x128xf32>
    %2 = tpu.matmul %0, %1, %cst {dimension_numbers = #tpu.dot_dimension_numbers<[1], [0], [0], [1], [0, 0, 1, 1], [], []>} : vector<16x64xf32>, vector<64x128xf32>, vector<16x128xf32> -> vector<16x128xf32>
    %c0_3 = arith.constant 0 : index
    %c0_4 = arith.constant 0 : index
    %3 = memref.load %arg2[%c0_3, %c0_4] : memref<1x1xf32, #tpu.memory_space<smem>>
    %4 = vector.broadcast %3 : f32 to vector<16x128xf32>
    %5 = arith.mulf %2, %4 : vector<16x128xf32>
    %c0_5 = arith.constant 0 : index
    %c0_6 = arith.constant 0 : index
    %6 = vector.load %arg5[%c0_5, %c0_6] : memref<1x128xf32, #tpu.memory_space<vmem>>, vector<1x128xf32>
    %7 = vector.broadcast %6 : vector<1x128xf32> to vector<16x128xf32>
    %8 = arith.addf %5, %7 : vector<16x128xf32>
    %9 = math.cos %8 : vector<16x128xf32>
    %c0_7 = arith.constant 0 : index
    %c0_8 = arith.constant 0 : index
    %10 = vector.load %arg6[%c0_7, %c0_8] : memref<16x128xf32, #tpu.memory_space<vmem>>, vector<16x128xf32>
    tpu.vector_store %arg6[%c0_7, %c0_8], %9 {strides = array<i32>} : memref<16x128xf32, #tpu.memory_space<vmem>>, vector<16x128xf32>,
    return
  }
  func.func @transform_0(%arg0: i32, %arg1: i32) -> (i32, i32) {
    %c0_i32 = arith.constant 0 : i32
    %c0_i32_0 = arith.constant 0 : i32
    %c0_i32_1 = arith.constant 0 : i32
    return %c0_i32, %c0_i32_0 : i32, i32
  }
  func.func @transform_1(%arg0: i32, %arg1: i32) -> (i32, i32) {
    %c0_i32 = arith.constant 0 : i32
    %c0_i32_0 = arith.constant 0 : i32
    return %arg0, %c0_i32 : i32, i32
  }
  func.func @transform_2(%arg0: i32, %arg1: i32) -> (i32, i32) {
    %c0_i32 = arith.constant 0 : i32
    %c0_i32_0 = arith.constant 0 : i32
    return %c0_i32, %arg1 : i32, i32
  }
  func.func @transform_3(%arg0: i32, %arg1: i32) -> (i32, i32) {
    %c0_i32 = arith.constant 0 : i32
    %c0_i32_0 = arith.constant 0 : i32
    return %c0_i32, %arg1 : i32, i32
  }
  func.func @transform_4(%arg0: i32, %arg1: i32) -> (i32, i32) {
    %c0_i32 = arith.constant 0 : i32
    return %arg0, %arg1 : i32, i32
  }
}

</mosaic_0001>

<bundles_post_ra>
// kernel: random_fourier_features.1
= control target key start
LH: loop header
LB: loop body
LE: loop exit
PB: predicated region body
PF: predicated region fallthrough
CT: control target
= control target key end

     0   :  { %s1317_s0 = inlined_call_operand.<no memory space> [shape: f32[1,1], index: 0, kind: input, shape index: {}]   ;;  %s1318_s1 = inlined_call_operand.hbm [shape: f32[16,64], index: 1, kind: input, shape index: {}]   ;;  %s1319_s2 = inlined_call_operand.hbm [shape: f32[64,256], index: 2, kind: input, shape index: {}]   ;;  %s1320_s3 = inlined_call_operand.vmem [shape: f32[1,256], index: 3, kind: input, shape index: {}]   ;;  %s1321_s4 = inlined_call_operand.hbm [shape: f32[16,256], index: 4, kind: output, shape index: {}]  }
   0x1   :  { %9 = sst [smem:[#allocation2]] %s1317_s0 }
   0x2   :  { %10 = vsyncpa [#allocation4], 0 }
   0x3   :  { %11 = vsyncpa [#allocation7], 0 }
   0x4   :  { %13 = vsyncpa [#allocation7 + $0x1], 0 }
   0x5   :  { %14 = vsyncpa [#allocation5], 0 }
   0x6   :  { %16 = vsyncpa [#allocation5 + $0x1], 0  ;;  %s1043_s17 = smov 0   ;;  %s1045_s18 = smov 0  }
   0x7   :  { %s1047_s19 = smov 0   ;;  %s1049_s20 = smov 0  }
   0x8   :  { %s1051_s21 = smov 0   ;;  %s1053_s22 = smov 0  }
   0x9 LB: > { %1328 = sst [smem:[#allocation12_spill]] %s998_s22  ;;  %s704_s0 = sadd.s32 4294967295, %s998_s22   ;;  %s998_s22 = sphi %s1053_s22, %s22_s22   ;;  %s994_s21 = sphi %s1051_s21, %s1353_s21   ;;  %s990_s20 = sphi %s1049_s20, %s1352_s20   ;;  %s986_s19 = sphi %s1047_s19, %s1351_s19   ;;  %s982_s18 = sphi %s1045_s18, %s1350_s18   ;;  %s978_s17 = sphi %s1043_s17, %s1349_s17  }
   0xa   : > { %s705_s23 = sadd.s32 4294967294, %s998_s22   ;;  %p95_p0 = scmp.ne.s32.totalorder %s986_s19, %s982_s18 }
   0xb   : > { %p96_p1 = scmp.eq.s32.totalorder %s998_s22, 0  ;;  %p101_p2 = scmp.ne.s32.totalorder %s982_s18, %s978_s17 }
   0xc   : > { %p1080_p3 = scmp.eq.s32.totalorder %s704_s0, 0  ;;  %p153_p5 = scmp.eq.s32.totalorder %s704_s0, 1 }
   0xd   : > { %p1084_p4 = por %p96_p1, %p95_p0  ;;  %p159_p7 = scmp.eq.s32.totalorder %s705_s23, 1 }
   0xe   : > { %p1090_p6 = por %p1080_p3, %p101_p2  ;;  %p1094_p8 = por %p153_p5, %p95_p0 }
   0xf   : > { %p706_p9 = scmp.ge.s32.totalorder %s998_s22, 1  ;;  %p1099_p10 = por %p159_p7, %p101_p2 }
  0x10   : > { %s1331_s26 = scalar_select %p1090_p6, 1, 0 }
  0x11   : > { %s1332_s27 = scalar_select %p1094_p8, 1, 0 }
  0x12   : > { %s1333_s28 = scalar_select %p1099_p10, 1, 0 }
  0x13   : > { %p166_p11 = scmp.lt.s32.totalorder %s998_s22, 3  ;;  %s1000_s30 = smov [#allocation3]  }
  0x14   : > { %1334 = sst [smem:[#allocation13_spill]] %s1333_s28  ;;  %s184_s5 = sshll.u32 %s1000_s30, 4  ;;  %s185_s5 = int_to_ptr.vmem [resolvable:$true] %s184_s5 }
  0x15   : > { %p1104_p12 = pnand %p706_p9, %p166_p11  ;;  %p788_p1 = scmp.lt.s32.totalorder %s998_s22, 2 }
  0x16   : > { %s31_s8 = sadd.s32 1, %s994_s21  ;;  %s871_s9 = scalar_lea.vmem %s185_s5, 256 }
  0x17   : > { %p775_p13 = pneg %p1104_p12  ;;  %p1120_p2 = pnand %p788_p1, %p1084_p4 }
  0x18   : > { %p872_p9 = scmp.ne.s32.totalorder %s185_s5, %s871_s9  ;;  %p879_p0 = scmp.lt.s32.totalorder %s185_s5, %s185_s5 }
  0x19   : > { %p1114_p5 = pnand %p775_p13, %p1080_p3  ;;  %p880_p8 = scmp.lt.s32.totalorder %s871_s9, %s871_s9 }
  0x1b   : > { %p862_p7 = pneg %p1114_p5  ;;  %p881_p6 = por %p880_p8, %p879_p0 }
  0x1d   : > { %p874_p11 = pnand %p872_p9, %p862_p7 }
  0x1f   : > { %p875_p10 = pneg %p874_p11 }
  0x21   : > { %p882_p13 = pnand %p881_p6, %p875_p10 }
  0x23   : > { %885 = shalt.err (!%p882_p13)
}
  0x24   : > { %s1327_s10 = smov 128   ;;  %s1002_s11 = smov 8  }
  0x25   : > { %778 = dma.hbm_to_vmem [thread:$0]  (!%p1114_p5), %s1318_s1, 256, %s185_s5, [#allocation4], %s1327_s10, %s1327_s10, %s1002_s11  }
  0x26   : > { %p32_p4 = scmp.ge.s32.totalorder %s31_s8, 2  ;;  %s88_s14 = sadd.s32 1, %s986_s19 }
  0x27   : > { %s198_s15 = sand.u32 1, %s986_s19   ;;  %s710_s23 = sshll.u32 %s994_s21, 7 }
  0x28   : > { %s1355_s8 = smov (%p32_p4, %s31_s8), 0  ;;  %s709_s16 = sshll.u32 %s198_s15, 6 }
  0x29   : > { %s85_s0 = ssub.s32 %s994_s21, %s1355_s8  ;;  %s207_s6 = scalar_lea.hbm %s1319_s2, %s710_s23 }
  0x2a   : > { %p86_p6 = scmp.eq.s32.totalorder %s85_s0, 0  ;;  %s202_s9 = scalar_lea.vmem [#allocation6], %s709_s16 }
  0x2b   : > { %s208_s22 = sshll.u32 %s202_s9, 4  ;;  %s199_s5 = scalar_lea.sflag [#allocation7], %s198_s15  ;;  %s209_s22 = int_to_ptr.vmem [resolvable:$true] %s208_s22 }
  0x2c   : > { %s1146_s28 = scalar_select %p86_p6, %s986_s19, %s88_s14  }
  0x2d   : > { %p888_p8 = pneg %p1120_p2  ;;  %s899_s12 = scalar_lea.vmem %s209_s22, 1024 }
  0x2e   : > { %p900_p10 = scmp.ne.s32.totalorder %s209_s22, %s899_s12  ;;  %s1003_s13 = smov [#allocation6]  }
  0x2f   : > { %s904_s10 = sshll.u32 %s1003_s13, 4  ;;  %s905_s10 = int_to_ptr.vmem [resolvable:$false] %s904_s10 }
  0x30   : > { %p902_p0 = pnand %p900_p10, %p888_p8  ;;  %s906_s0 = scalar_lea.vmem %s905_s10, 2048 }
  0x31   : > { %p907_p5 = scmp.lt.s32.totalorder %s209_s22, %s905_s10  ;;  %p908_p7 = scmp.lt.s32.totalorder %s906_s0, %s899_s12 }
  0x32   : > { %p903_p1 = pneg %p902_p0 }
  0x33   : > { %p909_p9 = por %p908_p7, %p907_p5 }
  0x35   : > { %p910_p11 = pnand %p909_p9, %p903_p1 }
  0x37   : > { %913 = shalt.err (!%p910_p11)
}
  0x38   : > { %s1004_s16 = smov 256   ;;  %s1338_s14 = smov 128  }
  0x39   : > { %782 = dma.hbm_to_vmem [thread:$0]  (!%p1120_p2), %s207_s6, 1024, %s209_s22, %s199_s5, %s1004_s16, %s1338_s14, %s1002_s11  }
  0x3a   : > { %226 = sbr.rel (%p1104_p12) target bundleno = 389 (0x185), region = 36 }
  0x3f   : > { %965 = dma.done.wait (%p1080_p3), [#allocation4], 256  }
  0x40   : > { %967 = vsyncadd (%p1080_p3), [#allocation4], 4294967040  ;;  %s1161_s10 = sand.u32 1, %s982_s18   ;;  %p1339_p13 = scmp.ne.s32.totalorder %s1331_s26, 0 }
  0x41   : > { %s713_s15 = sshll.u32 %s1161_s10, 6  ;;  %s233_s7 = scalar_lea.sflag [#allocation7], %s1161_s10 }
  0x42   : > { %s236_s23 = scalar_lea.vmem [#allocation6], %s713_s15 }
  0x43   : > { %969 = dma.done.wait (%p1339_p13), %s233_s7, 1024  }
  0x44   : > { %971 = vsyncadd (%p1339_p13), %s233_s7, 4294966272  ;;  %v278_v0 = vld [vmem:[%s236_s23 + $0x38] sm:$0xff]  ;;  %v277_v1 = vld [vmem:[%s236_s23 + $0x30] sm:$0xff]  ;;  %vm279_vm0 = vcmask 523264   ;;  %p265_p3 = scmp.lt.s32.totalorder %s990_s20, 1  ;;  %s361_s22 = sld [smem:[#allocation2]] }
  0x45   : > { %740 = vmatprep.subr.mxu0 %v278_v0  ;;  %v276_v2 = vld [vmem:[%s236_s23 + $0x28] sm:$0xff]  ;;  %v269_v3 = vld [vmem:[#allocation3] sm:$0xff]  ;;  %v275_v4 = vld [vmem:[%s236_s23 + $0x20] sm:$0xff]  ;;  %v1005_v36 = vmov 683565275   ;;  %s714_s25 = sshll.u32 %s1161_s10, 4 }
  0x46   : > { %741 = vmatpush3.msra.mxu0 %v278_v0  ;;  %756 = vmatprep.mubr.msk.f32.mxu0 %vm279_vm0, %v269_v3  ;;  %v274_v5 = vld [vmem:[%s236_s23 + $0x18] sm:$0xff]  ;;  %v273_v6 = vld [vmem:[%s236_s23 + $0x10] sm:$0xff]  ;;  %v272_v7 = vld [vmem:[%s236_s23 + $0x8] sm:$0xff]  ;;  %s266_s24 = scalar_select %p265_p3, %s990_s20, 1  ;;  %v1006_v39 = vmov 2475754826  }
  0x47   : > { %742 = vmatprep.subr.mxu0 %v277_v1  ;;  %v271_v8 = vld [vmem:[%s236_s23] sm:$0xff]  ;;  %v270_v9 = vld [vmem:[#allocation3 + $0x8] sm:$0xff]  ;;  %v1007_v41 = vmov 2131351028   ;;  %v1008_v43 = vmov 2102212464  }
  0x48   : > { %743 = vmatpush3.msra.mxu0 %v277_v1  ;;  %s267_s11 = scalar_lea.vmem %s1320_s3, %s266_s24  ;;  %v1009_v45 = vmov 920167782   ;;  %v1010_v52 = vmov 1326507024   ;;  %s263_s30 = scalar_lea.vmem [#allocation8], %s714_s25 }
  0x49   : > { %744 = vmatprep.subr.mxu0 %v276_v2  ;;  %v717_v12 = vld [vmem:[%s267_s11] ss:$0 sm:$0xff]  ;;  %s727_s6 = sshll.u32 %s990_s20, 7  ;;  %s598_s9 = sshll.u32 %s263_s30, 4  ;;  %s1268_s9 = int_to_ptr.vmem [resolvable:$true] %s598_s9 }
  0x4a   : > { %745 = vmatpush3.msra.mxu0 %v276_v2  ;;  %v362_v10 = vstv %s361_s22  ;;  %s1266_s13 = scalar_lea.hbm %s1321_s4, %s727_s6  ;;  %s583_s20 = scalar_lea.sflag [#allocation5], %s1161_s10 }
  0x4b   : > { %746 = vmatprep.subr.mxu0 %v275_v4  ;;  %s914_s0 = scalar_lea.vmem %s1268_s9, 256  ;;  %p1344_p2 = scmp.ne.s32.totalorder %s1332_s27, 0 }
  0x4c   : > { %747 = vmatpush3.msra.mxu0 %v275_v4  ;;  %p915_p12 = scmp.ne.s32.totalorder %s1268_s9, %s914_s0  ;;  %s1011_s16 = smov [#allocation8]  }
  0x4d   : > { %748 = vmatprep.subr.mxu0 %v274_v5  ;;  %s918_s14 = sshll.u32 %s1011_s16, 4  ;;  %s919_s14 = int_to_ptr.vmem [resolvable:$false] %s918_s14 }
  0x4e   : > { %749 = vmatpush3.msra.mxu0 %v274_v5  ;;  %p916_p4 = pnand %p915_p12, %p1344_p2  ;;  %s920_s15 = scalar_lea.vmem %s919_s14, 512 }
  0x4f   : > { %750 = vmatprep.subr.mxu0 %v273_v6  ;;  %p921_p8 = scmp.lt.s32.totalorder %s1268_s9, %s919_s14  ;;  %p922_p10 = scmp.lt.s32.totalorder %s920_s15, %s914_s0 }
  0x50   : > { %751 = vmatpush3.msra.mxu0 %v273_v6  ;;  %p917_p6 = pneg %p916_p4 }
  0x51   : > { %752 = vmatprep.subr.mxu0 %v272_v7  ;;  %p923_p0 = por %p922_p10, %p921_p8 }
  0x52   : > { %753 = vmatpush3.msra.mxu0 %v272_v7 }
  0x53   : > { %754 = vmatprep.subr.mxu0 %v271_v8  ;;  %p924_p1 = pnand %p923_p0, %p917_p6 }
  0x54   : > { %755 = vmatpush3.msra.mxu0 %v271_v8 }
  0x55   : > { %757 = vmatmul.mubr.msk.f32.vlgmr.msra.gmra.mxu0 %vm279_vm0, %v270_v9 }
 0x115   : > { %v758_v11 = vpop.f32.mrf.mxu0 }
 0x116   : > { %v364_v13 = vmul.f32 %v758_v11, %v362_v10 }
 0x117   : > { %v352_v14 = vpop.f32.mrf.mxu0 }
 0x118   : > { %v1176_v15 = vadd.f32 %v717_v12, %v364_v13  ;;  %v363_v16 = vmul.f32 %v362_v10, %v352_v14 }
 0x11a   : > { %v477_v17 = vand.u32 2147483647, %v1176_v15  ;;  %v480_v18 = vand.u32 2139095040, %v1176_v15  ;;  %v1180_v19 = vadd.f32 %v717_v12, %v363_v16  ;;  %vm479_vm15 = vcmp.lt.s32.totalorder %v1176_v15, 0 }
 0x11c   : > { %v481_v20 = vshrl.u32 %v480_v18, 23  ;;  %v484_v21 = vand.u32 8388607, %v477_v17  ;;  %v377_v22 = vand.u32 2139095040, %v1180_v19  ;;  %v374_v24 = vand.u32 2147483647, %v1180_v19 }
 0x11d   : > { %vm1233_vm0 = vcmp.le.f32.partialorder %v477_v17, 0.7853982 }
 0x11e   : > { %v722_v23 = vadd.s32 4294967169, %v481_v20  ;;  %v378_v25 = vshrl.u32 %v377_v22, 23  ;;  %v485_v27 = vor.u32 8388608, %v484_v21  ;;  %v381_v29 = vand.u32 8388607, %v374_v24 }
 0x120   : > { %v487_v26 = vadd.s32 1, %v722_v23  ;;  %v718_v28 = vadd.s32 4294967169, %v378_v25  ;;  %v1188_v34 = vshll.u32 %v485_v27, 8  ;;  %v382_v38 = vor.u32 8388608, %v381_v29 }
 0x122   : > { %vm488_vm1 = vcmp.gt.s32.totalorder %v487_v26, 0  ;;  %v384_v31 = vadd.s32 1, %v718_v28  ;;  %v422_v7 = vshll.u32 %v382_v38, 8 }
 0x123   : > { %v489_v30 = vsel %vm488_vm1, %v487_v26, 0  ;;  %vm376_vm1 = vcmp.lt.s32.totalorder %v1180_v19, 0 }
 0x124   : > { %v490_v32 = vshrl.u32 %v489_v30, 5  ;;  %v491_v33 = vand.u32 31, %v489_v30  ;;  %vm385_vm2 = vcmp.gt.s32.totalorder %v384_v31, 0 }
 0x125   : > { %v386_v57 = vsel %vm385_vm2, %v384_v31, 0  ;;  %vm1245_vm2 = vcmp.le.f32.partialorder %v374_v24, 0.7853982 }
 0x126   : > { %v492_v35 = vsub.s32 32, %v491_v33  ;;  %v494_v37 = vshll.u32 %v1005_v36, %v491_v33  ;;  %v497_v40 = vshll.u32 %v1006_v39, %v491_v33  ;;  %v500_v42 = vshll.u32 %v1007_v41, %v491_v33 }
 0x127   : > { %v503_v44 = vshll.u32 %v1008_v43, %v491_v33  ;;  %v506_v46 = vshll.u32 %v1009_v45, %v491_v33  ;;  %vm509_vm3 = vcmp.lt.s32.totalorder %v490_v32, 1  ;;  %vm511_vm4 = vcmp.lt.s32.totalorder %v490_v32, 3 }
 0x128   : > { %v495_v47 = vshrl.u32 %v1006_v39, %v492_v35  ;;  %v498_v48 = vshrl.u32 %v1007_v41, %v492_v35  ;;  %v501_v49 = vshrl.u32 %v1008_v43, %v492_v35  ;;  %v493_v50 = vshrl.u32 %v1005_v36, %v492_v35 }
 0x129   : > { %v504_v51 = vshrl.u32 %v1009_v45, %v492_v35  ;;  %v507_v53 = vshrl.u32 %v1010_v52, %v492_v35  ;;  %vm512_vm5 = vcmp.lt.s32.totalorder %v490_v32, 4  ;;  %v388_v60 = vand.u32 31, %v386_v57 }
 0x12a   : > { %v496_v54 = vor.u32 %v495_v47, %v494_v37  ;;  %v499_v55 = vor.u32 %v498_v48, %v497_v40  ;;  %v502_v56 = vor.u32 %v501_v49, %v500_v42  ;;  %vm510_vm6 = vcmp.lt.s32.totalorder %v490_v32, 2 }
 0x12b   : > { %v505_v58 = vor.u32 %v504_v51, %v503_v44  ;;  %v508_v59 = vor.u32 %v507_v53, %v506_v46  ;;  %v389_v4 = vsub.s32 32, %v388_v60  ;;  %v387_v11 = vshrl.u32 %v386_v57, 5 }
 0x12c   : > { %v513_v61 = vsel %vm509_vm3, %v493_v50, %v496_v54  ;;  %v514_v62 = vsel %vm512_vm5, %v502_v56, 2102212464  ;;  %v517_v63 = vsel %vm509_vm3, %v496_v54, %v499_v55  ;;  %v521_v0 = vsel %vm509_vm3, %v499_v55, %v502_v56 }
 0x12d   : > { %v515_v1 = vsel %vm511_vm4, %v499_v55, %v514_v62  ;;  %v518_v2 = vsel %vm512_vm5, %v505_v58, 920167782  ;;  %v522_v3 = vsel %vm512_vm5, %v508_v59, 1326507024  ;;  %v391_v18 = vshll.u32 %v1005_v36, %v388_v60 }
 0x12e   : > { %v519_v5 = vsel %vm511_vm4, %v502_v56, %v518_v2  ;;  %v523_v6 = vsel %vm511_vm4, %v505_v58, %v522_v3  ;;  %v516_v8 = vsel %vm510_vm6, %v513_v61, %v515_v1  ;;  %v392_v20 = vshrl.u32 %v1006_v39, %v389_v4 }
 0x12f   : > { %v520_v9 = vsel %vm510_vm6, %v517_v63, %v519_v5  ;;  %v524_v10 = vsel %vm510_vm6, %v521_v0, %v523_v6  ;;  %v394_v21 = vshll.u32 %v1006_v39, %v388_v60  ;;  %v395_v22 = vshrl.u32 %v1007_v41, %v389_v4 }
 0x130   : > { %v1200_v12 = vmul.u32.u64.low %v1188_v34, %v524_v10  ;;  %v1201_v13 = vmul.u32.u64.high %v1188_v34, %v524_v10, %v1200_v12  ;;  %v1204_v14 = vmul.u32.u64.low %v1188_v34, %v520_v9  ;;  %v1205_v16 = vmul.u32.u64.high %v1188_v34, %v520_v9, %v1204_v14 }
 0x131   : > { %v397_v23 = vshll.u32 %v1007_v41, %v388_v60  ;;  %v398_v25 = vshrl.u32 %v1008_v43, %v389_v4  ;;  %v400_v26 = vshll.u32 %v1008_v43, %v388_v60  ;;  %v401_v27 = vshrl.u32 %v1009_v45, %v389_v4 }
 0x132   : > { %v393_v28 = vor.u32 %v392_v20, %v391_v18  ;;  %v396_v29 = vor.u32 %v395_v22, %v394_v21  ;;  %v403_v30 = vshll.u32 %v1009_v45, %v388_v60  ;;  %v404_v31 = vshrl.u32 %v1010_v52, %v389_v4 }
 0x133   : > { %v532_v32 = vmul.u32 %v1188_v34, %v516_v8  ;;  %vm534_vm7 = vc.u32 %v1201_v13, %v1204_v14  ;;  %v535_v33 = vadd.s32 1, %v1205_v16  ;;  %v399_v35 = vor.u32 %v398_v25, %v397_v23 }
 0x134   : > { %v390_v37 = vshrl.u32 %v1005_v36, %v389_v4  ;;  %v402_v38 = vor.u32 %v401_v27, %v400_v26  ;;  %v405_v39 = vor.u32 %v404_v31, %v403_v30  ;;  %vm406_vm8 = vcmp.lt.s32.totalorder %v387_v11, 1 }
 0x135   : > { %v536_v40 = vsel %vm534_vm7, %v535_v33, %v1205_v16  ;;  %vm408_vm9 = vcmp.lt.s32.totalorder %v387_v11, 3  ;;  %vm409_vm10 = vcmp.lt.s32.totalorder %v387_v11, 4  ;;  %v414_v41 = vsel %vm406_vm8, %v393_v28, %v396_v29 }
 0x136   : > { %v537_v42 = vadd.s32 %v536_v40, %v532_v32  ;;  %v411_v43 = vsel %vm409_vm10, %v399_v35, 2102212464  ;;  %v415_v44 = vsel %vm409_vm10, %v402_v38, 920167782  ;;  %v418_v34 = vsel %vm406_vm8, %v396_v29, %v399_v35 }
 0x137   : > { %vm407_vm11 = vcmp.lt.s32.totalorder %v387_v11, 2  ;;  %v410_v45 = vsel %vm406_vm8, %v390_v37, %v393_v28  ;;  %v416_v46 = vsel %vm408_vm9, %v399_v35, %v415_v44  ;;  %v419_v47 = vsel %vm409_vm10, %v405_v39, 1326507024 }
 0x138   : > { %v538_v48 = vadd.s32 536870912, %v537_v42  ;;  %v412_v49 = vsel %vm408_vm9, %v396_v29, %v411_v43  ;;  %v417_v50 = vsel %vm407_vm11, %v414_v41, %v416_v46  ;;  %v420_v36 = vsel %vm408_vm9, %v402_v38, %v419_v47 }
 0x139   : > { %v421_v51 = vsel %vm407_vm11, %v418_v34, %v420_v36  ;;  %v1215_v52 = vmul.u32.u64.low %v422_v7, %v417_v50  ;;  %v1216_v53 = vmul.u32.u64.high %v422_v7, %v417_v50, %v1215_v52  ;;  %v413_v57 = vsel %vm407_vm11, %v410_v45, %v412_v49 }
 0x13a   : > { %v539_v54 = vshrl.u32 %v538_v48, 30  ;;  %v1218_v55 = vmul.u32.u64.low %v422_v7, %v421_v51  ;;  %v1219_v56 = vmul.u32.u64.high %v422_v7, %v421_v51, %v1218_v55  ;;  %v429_v61 = vmul.u32 %v422_v7, %v413_v57 }
 0x13b   : > { %v432_v59 = vadd.s32 1, %v1216_v53  ;;  %v533_v7 = vadd.s32 %v1204_v14, %v1201_v13  ;;  %vm569_vm6 = vweird.f32 %v1176_v15  ;;  %vm466_vm10 = vweird.f32 %v1180_v19 }
 0x13c   : > { %v540_v58 = vshll.u32 %v539_v54, 30  ;;  %vm431_vm12 = vc.u32 %v1219_v56, %v1215_v52  ;;  %v430_v32 = vadd.s32 %v1215_v52, %v1219_v56  ;;  %v563_v44 = vsub.s32 4, %v539_v54 }
 0x13d   : > { %v433_v62 = vsel %vm431_vm12, %v432_v59, %v1216_v53 }
 0x13e   : > { %v541_v60 = vsub.s32 %v537_v42, %v540_v58  ;;  %v434_v0 = vadd.s32 %v433_v62, %v429_v61  ;;  %v564_v47 = vsel %vm479_vm15, %v563_v44, %v539_v54 }
 0x13f   : > { %v566_v49 = vsel %vm1233_vm0, 0, %v564_v47 }
 0x140   : > { %v543_v63 = vsub.s32 0, %v541_v60  ;;  %v435_v2 = vadd.s32 536870912, %v434_v0  ;;  %v570_v52 = vand.u32 3, %v566_v49 }
 0x142   : > { %v723_v1 = vmin.u32 %v543_v63, %v541_v60  ;;  %v1224_v4 = vshrl.u32 %v435_v2, 30  ;;  %vm575_vm3 = vcmp.eq.s32.totalorder %v570_v52, 2  ;;  %vm572_vm4 = vcmp.eq.s32.totalorder %v570_v52, 0 }
 0x143   : > { %vm571_vm5 = vcmp.lt.s32.totalorder %v570_v52, 2 }
 0x144   : > { %v545_v3 = vclz %v723_v1  ;;  %v437_v6 = vshll.u32 %v1224_v4, 30  ;;  %v460_v53 = vsub.s32 4, %v1224_v4 }
 0x146   : > { %v724_v5 = vadd.s32 4294967294, %v545_v3  ;;  %v438_v9 = vsub.s32 %v434_v0, %v437_v6  ;;  %v461_v58 = vsel %vm376_vm1, %v460_v53, %v1224_v4 }
 0x147   : > { %v463_v62 = vsel %vm1245_vm2, 0, %v461_v58 }
 0x148   : > { %vm725_vm13 = vcmp.lt.s32.totalorder %v724_v5, 0  ;;  %v440_v12 = vsub.s32 0, %v438_v9  ;;  %v467_v63 = vand.u32 3, %v463_v62 }
 0x149   : > { %v548_v8 = vsel %vm725_vm13, 0, %v724_v5 }
 0x14a   : > { %v549_v10 = vsub.s32 32, %v548_v8  ;;  %v553_v11 = vsub.s32 4294967266, %v548_v8  ;;  %v550_v16 = vshll.u32 %v541_v60, %v548_v8  ;;  %v719_v21 = vmin.u32 %v440_v12, %v438_v9 }
 0x14b   : > { %vm472_vm7 = vcmp.eq.s32.totalorder %v467_v63, 2  ;;  %vm469_vm8 = vcmp.eq.s32.totalorder %v467_v63, 0  ;;  %vm468_vm9 = vcmp.lt.s32.totalorder %v467_v63, 2 }
 0x14c   : > { %v551_v18 = vshrl.u32 %v533_v7, %v549_v10  ;;  %v554_v20 = vadd.s32 127, %v553_v11  ;;  %v442_v25 = vclz %v719_v21 }
 0x14e   : > { %v552_v22 = vor.u32 %v551_v18, %v550_v16  ;;  %v555_v23 = vshll.u32 %v554_v20, 23  ;;  %v720_v27 = vadd.s32 4294967294, %v442_v25 }
 0x150   : > { %v556_v26 = vor.u32 4788187, %v555_v23  ;;  %v559_v29 = vcvt.s32.f32 %v552_v22  ;;  %vm721_vm14 = vcmp.lt.s32.totalorder %v720_v27, 0 }
 0x151   : > { %v445_v31 = vsel %vm721_vm14, 0, %v720_v27 }
 0x152   : > { %v557_v28 = vand.u32 2147483647, %v556_v26  ;;  %v446_v13 = vsub.s32 32, %v445_v31  ;;  %v450_v14 = vsub.s32 4294967266, %v445_v31  ;;  %v447_v35 = vshll.u32 %v438_v9, %v445_v31 }
 0x154   : > { %v560_v30 = vmul.f32 %v559_v29, %v557_v28  ;;  %v448_v37 = vshrl.u32 %v430_v32, %v446_v13  ;;  %v451_v38 = vadd.s32 127, %v450_v14 }
 0x156   : > { %v561_v33 = vxor.u32 2147483648, %v560_v30  ;;  %v449_v42 = vor.u32 %v448_v37, %v447_v35  ;;  %v452_v43 = vshll.u32 %v451_v38, 23 }
 0x158   : > { %v562_v40 = vsel %vm479_vm15, %v561_v33, %v560_v30  ;;  %v453_v34 = vor.u32 4788187, %v452_v43  ;;  %v456_v46 = vcvt.s32.f32 %v449_v42 }
 0x159   : > { %v565_v41 = vsel %vm1233_vm0, %v1176_v15, %v562_v40 }
 0x15a   : > { %852 = vcosq.f32 %v565_v41  ;;  %v454_v45 = vand.u32 2147483647, %v453_v34 }
 0x15b   : > { %854 = vsinq.f32 %v565_v41 }
 0x15c   : > { %v457_v48 = vmul.f32 %v456_v46, %v454_v45 }
 0x15e   : > { %v458_v17 = vxor.u32 2147483648, %v457_v48 }
 0x160   : > { %v459_v36 = vsel %vm376_vm1, %v458_v17, %v457_v48 }
 0x161   : > { %v462_v51 = vsel %vm1245_vm2, %v1180_v19, %v459_v36 }
 0x162   : > { %856 = vcosq.f32 %v462_v51 }
 0x163   : > { %858 = vsinq.f32 %v462_v51 }
 0x167   : > { %v853_v54 = vpop.eup %852 }
 0x168   : > { %v855_v55 = vpop.eup %854  ;;  %v576_v56 = vxor.u32 2147483648, %v853_v54 }
 0x169   : > { %v573_v24 = vxor.u32 2147483648, %v855_v55 }
 0x16a   : > { %v577_v57 = vsel %vm575_vm3, %v576_v56, %v855_v55 }
 0x16b   : > { %v574_v59 = vsel %vm572_vm4, %v853_v54, %v573_v24 }
 0x16c   : > { %v578_v60 = vsel %vm571_vm5, %v574_v59, %v577_v57 }
 0x16d   : > { %v579_v61 = vsel %vm569_vm6, nan, %v578_v60 }
 0x16e   : > { %581 = vst [vmem:[%s263_s30 + $0x8] sm:$0xff] %v579_v61 }
 0x16f   : > { %v857_v0 = vpop.eup %856 }
 0x170   : > { %v859_v1 = vpop.eup %858  ;;  %v473_v2 = vxor.u32 2147483648, %v857_v0 }
 0x171   : > { %v470_v3 = vxor.u32 2147483648, %v859_v1 }
 0x172   : > { %v474_v4 = vsel %vm472_vm7, %v473_v2, %v859_v1 }
 0x173   : > { %v471_v15 = vsel %vm469_vm8, %v857_v0, %v470_v3 }
 0x174   : > { %v475_v5 = vsel %vm468_vm9, %v471_v15, %v474_v4 }
 0x175   : > { %v476_v6 = vsel %vm466_vm10, nan, %v475_v5 }
 0x176   : > { %580 = vst [vmem:[%s263_s30] sm:$0xff] %v476_v6 }
 0x177   : > { %927 = shalt.err (!%p924_p1)
}
 0x178   : > { %s928_s7 = scalar_lea.hbm %s1266_s13, 256  ;;  %s932_s24 = scalar_lea.hbm %s1321_s4, 512 }
 0x179   : > { %p929_p5 = scmp.ne.s32.totalorder %s1266_s13, %s928_s7  ;;  %p933_p11 = scmp.lt.s32.totalorder %s1266_s13, %s1321_s4 }
 0x17a   : > { %p934_p13 = scmp.lt.s32.totalorder %s932_s24, %s928_s7 }
 0x17b   : > { %p930_p7 = pnand %p929_p5, %p1344_p2 }
 0x17c   : > { %p935_p3 = por %p934_p13, %p933_p11 }
 0x17d   : > { %p931_p9 = pneg %p930_p7 }
 0x17f   : > { %p936_p12 = pnand %p935_p3, %p931_p9 }
 0x181   : > { %939 = shalt.err (!%p936_p12)
}
 0x182   : > { %s1012_s11 = smov 128   ;;  %s1013_s25 = smov 256  }
 0x183   : > { %s1014_s30 = smov 8  }
 0x184   : > { %773 = dma.vmem_to_hbm [thread:$0]  (%p1344_p2), %s1268_s9, 256, %s1266_s13, %s583_s20, %s1012_s11, %s1013_s25, %s1014_s30  }
 0x185 PF: > { %s1345_s6 = sld [smem:[#allocation13_spill]]  ;;  %s613_s12 = sand.u32 1, %s978_s17  }
 0x186   : > { %s1346_s5 = sld [smem:[#allocation12_spill]]  ;;  %s614_s0 = scalar_lea.sflag [#allocation5], %s613_s12 }
 0x18b   : > { %p1347_p4 = scmp.ne.s32.totalorder %s1345_s6, 0 }
 0x18c   : > { %p1348_p6 = scmp.ge.s32.totalorder %s1346_s5, 2 }
 0x18e   : > { %p784_p8 = pnand %p1348_p6, %p1347_p4 }
 0x190   : > { %p785_p10 = pneg %p784_p8 }
 0x192   : > { %973 = dma.done.wait (%p785_p10), %s614_s0, 256  }
 0x193   : > { %975 = vsyncadd (%p785_p10), %s614_s0, 4294967040  ;;  %s22_s22 = sadd.s32 1, %s1346_s5   ;;  %s1349_s17 = smov %s982_s18 }
 0x194   : > { %p19_p0 = scmp.ge.s32.totalorder %s22_s22, 4   ;;  %s1350_s18 = smov %s986_s19 }
 0x195   : > { %s1351_s19 = smov %s1146_s28  ;;  %s1352_s20 = smov %s994_s21 }
 0x196   : > { %s1353_s21 = smov %s1355_s8  ;;  %21 = sbr.rel (!%p19_p0) target bundleno = 9 (0x9), region = 90 }
 0x19b   :  { %619 = vsyncpa [#allocation4], 1 }
 0x19c   :  { %621 = vsyncpa [#allocation4 + $0x1], 1 }
 0x19d   :  { %622 = vsyncpa [#allocation7], 1 }
 0x19e   :  { %624 = vsyncpa [#allocation7 + $0x1], 1 }
 0x19f   :  { %625 = vsyncpa [#allocation5], 1 }
 0x1a0   :  { %627 = vsyncpa [#allocation5 + $0x1], 1 }

</bundles_post_ra>
